<compile_context>
chip_gen: v7x
topology: tpu7x:2x2x1
jax: 0.10.0
libtpu: 0.0.40
codegen_flags: <defaults>
</compile_context>

<pallas_src>
import jax
import jax.numpy as jnp
from jax.experimental import pallas as pl
from jax.experimental.pallas import tpu as pltpu


def _attention_kernel(q_ref, h_ref, o_ref):
    # q_ref: (1, H)      -- shared query (same for every batch row)
    # h_ref: (TB, S, H)  -- TB batch rows of `hidden`
    # o_ref: (TB, H)
    h = h_ref[...]
    hf = h.astype(jnp.float32)                               # (TB, S, H)
    q = q_ref[...].astype(jnp.float32).reshape(1, 1, -1)     # (1, 1, H)

    # scores[b, s] = sum_h q[h] * hidden[b, s, h]
    # VPU multiply + lane (H) reduce -> dense (TB, S) f32 tile.
    scores = jnp.sum(hf * q, axis=-1)                        # (TB, S)

    # Numerically stable softmax over the seq axis (lane axis of (TB, S)).
    m = jnp.max(scores, axis=-1, keepdims=True)              # (TB, 1)
    e = jnp.exp(scores - m)                                  # (TB, S)
    l = jnp.sum(e, axis=-1, keepdims=True)                   # (TB, 1)

    # Weighted sum with unnormalized weights (VPU mul + sublane reduce over S),
    # then exact deferred normalization of the H outputs.
    acc = jnp.sum(e[:, :, None] * hf, axis=1)                # (TB, H)
    out = acc / l                                            # exact divide

    o_ref[...] = out.astype(o_ref.dtype)


def _vmem_capacity_bytes():
    # Generation-aware capacity (128 MiB on v5e/v6e, 64 MiB per TC on v7x).
    try:
        return int(pltpu.get_tpu_info().vmem_capacity_bytes)
    except Exception:
        return 64 * 2**20  # conservative fallback (works on every generation)


def attention_legalbasis(hidden, querys):
    """hidden: [B, S, H], querys: [1, H] -> [B, H] (or [H] if B == 1)."""
    assert hidden.shape[-1] == querys.shape[-1]
    B, S, H = hidden.shape
    itemsize = jnp.dtype(hidden.dtype).itemsize
    row_bytes = S * H * itemsize

    # --- batch-block (tb) selection ------------------------------------------
    # DMA-bytes target per hidden block (~4 MiB hits the HBM roofline in the
    # measured tiled sweeps), capped so the double-buffered block fits the
    # generation's VMEM with headroom for the output / query / compiler scratch.
    cap = _vmem_capacity_bytes()
    budget = int(cap * 0.45)                       # room for 2x hidden buffers
    target = min(4 * 2**20, max(row_bytes, budget // 2))
    tb_from_bytes = max(1, target // row_bytes)
    # Sublane-packing multiple so (tb, H) output stores are unmasked/dense.
    mult = {1: 32, 2: 16}.get(itemsize, 8)
    if tb_from_bytes >= B:
        tb = B                                     # single block == full dim
    else:
        tb = max(mult, (tb_from_bytes // mult) * mult)
        tb = min(tb, B)
    grid_b = pl.cdiv(B, tb)                        # no jnp.pad: partial last block

    # --- scoped VMEM request ---------------------------------------------------
    block_bytes = tb * row_bytes
    out_bytes = tb * H * itemsize
    q_bytes = H * jnp.dtype(querys.dtype).itemsize
    need = 2 * (block_bytes + out_bytes + q_bytes) + (4 << 20)
    vmem_limit = int(min(int(cap * 0.85), max(32 * 2**20, need)))

    cost = pl.CostEstimate(
        flops=4 * B * S * H,
        transcendentals=B * S,
        bytes_accessed=B * S * H * itemsize + B * H * itemsize + q_bytes,
    )

    out = pl.pallas_call(
        _attention_kernel,
        out_shape=jax.ShapeDtypeStruct((B, H), hidden.dtype),
        grid_spec=pltpu.PrefetchScalarGridSpec(
            num_scalar_prefetch=0,
            grid=(grid_b,),
            in_specs=[
                pl.BlockSpec((1, H), lambda b: (0, 0)),         # querys (shared)
                pl.BlockSpec((tb, S, H), lambda b: (b, 0, 0)),  # hidden block
            ],
            out_specs=pl.BlockSpec((tb, H), lambda b: (b, 0)),  # lane/sublane-dense
        ),
        compiler_params=pltpu.CompilerParams(
            dimension_semantics=("parallel",),
            vmem_limit_bytes=vmem_limit,
        ),
        cost_estimate=cost,
    )(querys, hidden)

    # torch.squeeze drops all size-1 dims -> [B, H] (or [H] when B == 1).
    return jnp.squeeze(out)


def _reference(hidden, querys):
    # Pure-JAX reference mirroring the PyTorch forward exactly.
    factor = jnp.matmul(hidden, querys.T)            # [B, S, 1]
    factor = jnp.transpose(factor, (0, 2, 1))        # [B, 1, S]
    factor = jax.nn.softmax(factor, axis=2)
    result = jnp.matmul(factor, hidden)              # [B, 1, H]
    return jnp.squeeze(result)


if __name__ == "__main__":
    key = jax.random.PRNGKey(0)
    k1, k2, k3 = jax.random.split(key, 3)

    # Primary small config.
    B, S, H = 2, 8, 32
    hidden = jax.random.normal(k1, (B, S, H), dtype=jnp.float32)
    querys = jax.random.normal(k2, (1, H), dtype=jnp.float32)

    out = jax.block_until_ready(attention_legalbasis(hidden, querys))
    ref = _reference(hidden, querys)
    assert out.shape == ref.shape == (B, H)
    assert jnp.allclose(out, ref, atol=1e-4, rtol=1e-4)

    # Batch not a multiple of 8 (exercises the tb == B full-block path and the
    # ragged-batch handling without any padding copy).
    B2 = 10
    hidden2 = jax.random.normal(k3, (B2, S, H), dtype=jnp.float32)
    out2 = jax.block_until_ready(attention_legalbasis(hidden2, querys))
    ref2 = _reference(hidden2, querys)
    assert out2.shape == ref2.shape == (B2, H)
    assert jnp.allclose(out2, ref2, atol=1e-4, rtol=1e-4)

    print("KERNEL_OK")
</pallas_src>

<mosaic_0001>
module attributes {stable_mosaic.version = 11 : i64} {
  func.func @_attention_kernel(%arg0: i32, %arg1: memref<1x32xf32, #tpu.memory_space<vmem>>, %arg2: memref<2x8x32xf32, #tpu.memory_space<vmem>>, %arg3: memref<2x32xf32, #tpu.memory_space<vmem>>) attributes {dimension_semantics = [#tpu.dimension_semantics<parallel>], iteration_bounds = array<i64: 1>, scalar_prefetch = 0 : i64, scratch_operands = 0 : i64, tpu.core_type = #tpu.core_type<tc>, window_params = [{pipeline_mode = #tpu.pipeline_mode<synchronous>, transform_indices = @transform_0, window_bounds = array<i64: 1, 32>}, {transform_indices = @transform_1, window_bounds = array<i64: 2, 8, 32>}, {transform_indices = @transform_2, window_bounds = array<i64: 2, 32>}]} {
    %c0 = arith.constant 0 : index
    %c0_0 = arith.constant 0 : index
    %c0_1 = arith.constant 0 : index
    %0 = vector.load %arg2[%c0, %c0_0, %c0_1] : memref<2x8x32xf32, #tpu.memory_space<vmem>>, vector<2x8x32xf32>
    %c0_2 = arith.constant 0 : index
    %c0_3 = arith.constant 0 : index
    %1 = vector.load %arg1[%c0_2, %c0_3] : memref<1x32xf32, #tpu.memory_space<vmem>>, vector<1x32xf32>
    %2 = vector.shape_cast %1 : vector<1x32xf32> to vector<1x1x32xf32>
    %3 = vector.broadcast %2 : vector<1x1x32xf32> to vector<2x8x32xf32>
    %4 = arith.mulf %0, %3 : vector<2x8x32xf32>
    %cst = arith.constant dense<0.000000e+00> : vector<2x8xf32>
    %5 = vector.multi_reduction <add>, %4, %cst [2] : vector<2x8x32xf32> to vector<2x8xf32>
    %cst_4 = arith.constant dense<0xFF800000> : vector<2xf32>
    %6 = vector.multi_reduction <maximumf>, %5, %cst_4 [1] : vector<2x8xf32> to vector<2xf32>
    %7 = vector.shape_cast %6 : vector<2xf32> to vector<2x1xf32>
    %8 = vector.broadcast %7 : vector<2x1xf32> to vector<2x8xf32>
    %9 = arith.subf %5, %8 : vector<2x8xf32>
    %10 = math.exp %9 : vector<2x8xf32>
    %cst_5 = arith.constant dense<0.000000e+00> : vector<2xf32>
    %11 = vector.multi_reduction <add>, %10, %cst_5 [1] : vector<2x8xf32> to vector<2xf32>
    %12 = vector.shape_cast %11 : vector<2xf32> to vector<2x1xf32>
    %13 = vector.shape_cast %10 : vector<2x8xf32> to vector<2x8x1xf32>
    %14 = vector.broadcast %13 : vector<2x8x1xf32> to vector<2x8x32xf32>
    %15 = arith.mulf %14, %0 : vector<2x8x32xf32>
    %cst_6 = arith.constant dense<0.000000e+00> : vector<2x32xf32>
    %16 = vector.multi_reduction <add>, %15, %cst_6 [1] : vector<2x8x32xf32> to vector<2x32xf32>
    %17 = vector.broadcast %12 : vector<2x1xf32> to vector<2x32xf32>
    %18 = arith.divf %16, %17 : vector<2x32xf32>
    %c0_7 = arith.constant 0 : index
    %c0_8 = arith.constant 0 : index
    %19 = vector.load %arg3[%c0_7, %c0_8] : memref<2x32xf32, #tpu.memory_space<vmem>>, vector<2x32xf32>
    tpu.vector_store %arg3[%c0_7, %c0_8], %18 {strides = array<i32>} : memref<2x32xf32, #tpu.memory_space<vmem>>, vector<2x32xf32>,
    return
  }
  func.func @transform_0(%arg0: i32) -> (i32, i32) {
    %c0_i32 = arith.constant 0 : i32
    %c0_i32_0 = arith.constant 0 : i32
    %c0_i32_1 = arith.constant 0 : i32
    return %c0_i32, %c0_i32_0 : i32, i32
  }
  func.func @transform_1(%arg0: i32) -> (i32, i32, i32) {
    %c0_i32 = arith.constant 0 : i32
    %c0_i32_0 = arith.constant 0 : i32
    %c0_i32_1 = arith.constant 0 : i32
    return %arg0, %c0_i32, %c0_i32_0 : i32, i32, i32
  }
  func.func @transform_2(%arg0: i32) -> (i32, i32) {
    %c0_i32 = arith.constant 0 : i32
    %c0_i32_0 = arith.constant 0 : i32
    return %arg0, %c0_i32 : i32, i32
  }
}

</mosaic_0001>

<bundles_post_ra>
// kernel: tpu_custom_call.1
= control target key start
LH: loop header
LB: loop body
LE: loop exit
PB: predicated region body
PF: predicated region fallthrough
CT: control target
= control target key end

     0   :  { %7 = vsyncpa [#allocation3], 0  ;;  %s324_s0 = inlined_call_operand.hbm [shape: f32[1,32], index: 0, kind: input, shape index: {}]   ;;  %s325_s1 = inlined_call_operand.hbm [shape: f32[2,8,32], index: 1, kind: input, shape index: {}]   ;;  %s326_s2 = inlined_call_operand.hbm [shape: f32[2,32], index: 2, kind: output, shape index: {}]  }
   0x1   :  { %8 = vsyncpa [#allocation6], 0 }
   0x2   :  { %9 = vsyncpa [#allocation4], 0  ;;  %s251_s9 = smov [#allocation2]   ;;  %s252_s11 = smov [#allocation5]  }
   0x3   :  { %s16_s10 = sshll.u32 %s251_s9, 4  ;;  %s25_s12 = sshll.u32 %s252_s11, 4  ;;  %s17_s10 = int_to_ptr.vmem [resolvable:$true] %s16_s10  ;;  %s272_s12 = int_to_ptr.vmem [resolvable:$true] %s25_s12 }
   0x4   :  { %s179_s15 = scalar_lea.hbm %s324_s0, 16 }
   0x5   :  { %p180_p0 = scmp.ne.s32.totalorder %s324_s0, %s179_s15  ;;  %p183_p1 = scmp.lt.u32.totalorder %s179_s15, %s324_s0 }
   0x7   :  { %p185_p2 = pnand %p183_p1, %p180_p0 }
   0x9   :  { %188 = shalt.err (!%p185_p2)
}
   0xa   :  { %s189_s20 = scalar_lea.vmem %s17_s10, 16  ;;  %s193_s21 = scalar_lea.vmem %s17_s10, 32 }
   0xb   :  { %p190_p3 = scmp.ne.s32.totalorder %s17_s10, %s189_s20  ;;  %p194_p4 = scmp.lt.s32.totalorder %s17_s10, %s17_s10 }
   0xc   :  { %p195_p5 = scmp.lt.s32.totalorder %s193_s21, %s189_s20 }
   0xe   :  { %p196_p6 = por %p195_p5, %p194_p4 }
  0x10   :  { %p197_p7 = pnand %p196_p6, %p190_p3 }
  0x12   :  { %200 = shalt.err (!%p197_p7)
}
  0x13   :  { %19 = dma.hbm_to_vmem [thread:$0]  %s324_s0, 16, %s17_s10, [#allocation3]  }
  0x14   :  { %s201_s26 = scalar_lea.hbm %s325_s1, 256 }
  0x15   :  { %p202_p8 = scmp.ne.s32.totalorder %s325_s1, %s201_s26  ;;  %p205_p9 = scmp.lt.u32.totalorder %s201_s26, %s325_s1 }
  0x17   :  { %p207_p10 = pnand %p205_p9, %p202_p8 }
  0x19   :  { %210 = shalt.err (!%p207_p10)
}
  0x1a   :  { %s211_s3 = scalar_lea.vmem %s272_s12, 256  ;;  %p216_p12 = scmp.lt.s32.totalorder %s272_s12, %s272_s12 }
  0x1b   :  { %p212_p11 = scmp.ne.s32.totalorder %s272_s12, %s211_s3  ;;  %p217_p13 = scmp.lt.s32.totalorder %s211_s3, %s211_s3 }
  0x1d   :  { %p218_p0 = por %p217_p13, %p216_p12 }
  0x1f   :  { %p219_p1 = pnand %p218_p0, %p212_p11 }
  0x21   :  { %222 = shalt.err (!%p219_p1)
}
  0x22   :  { %s253_s0 = smov 128   ;;  %s254_s4 = smov 8  }
  0x23   :  { %31 = dma.hbm_to_vmem [thread:$0]  %s325_s1, 256, %s272_s12, [#allocation6], %s253_s0, %s253_s0, %s254_s4  }
  0x24   :  { %245 = dma.done.wait [#allocation3], 16  }
  0x25   :  { %246 = vsyncadd [#allocation3], 4294967280 }
  0x26   :  { %247 = dma.done.wait [#allocation6], 256  }
  0x27   :  { %248 = vsyncadd [#allocation6], 4294967040  ;;  %v38_v0 = vld [vmem:[#allocation5] sm:$0xff]  ;;  %v162_v1 = vld [vmem:[#allocation2] ss:$0 sm:$0xff]  ;;  %vm49_vm0 = vcmask 261120   ;;  %v58_v7 = vlaneseq }
  0x28   :  { %v39_v2 = vld [vmem:[#allocation5 + $0x8] sm:$0xff]  ;;  %v47_v3 = vmul.f32 %v162_v1, %v38_v0  ;;  %vm68_vm1 = vcmask 1041409   ;;  %vm71_vm2 = vcmask 58368   ;;  %v255_v17 = vmov 0   ;;  %s256_s1 = smov [#allocation7]  }
  0x29   :  { %v48_v4 = vmul.f32 %v162_v1, %v39_v2  ;;  %v59_v8 = vand.u32 127, %v58_v7  ;;  %v61_v9 = vshrl.u32 %v58_v7, 7  ;;  %170 = vset.pattern.permute.xlu0 %v255_v17  ;;  %169 = vset.pattern.permute.xlu1 %v255_v17  ;;  %s152_s7 = sshll.u32 %s256_s1, 4  ;;  %vm144_vm3 = vcmask 254976   ;;  %s153_s7 = int_to_ptr.vmem [resolvable:$true] %s152_s7 }
  0x2a   :  { %v50_v5 = vsel %vm49_vm0, %v47_v3, 0.0  ;;  %s223_s8 = scalar_lea.vmem %s153_s7, 32  ;;  %p228_p3 = scmp.lt.s32.totalorder %s153_s7, %s153_s7 }
  0x2b   :  { %51 = vadd.xlane.f32.xlu0 %v50_v5  ;;  %v53_v6 = vsel %vm49_vm0, %v48_v4, 0.0  ;;  %v62_v11 = vsub.s32 %v59_v8, %v61_v9  ;;  %v78_v18 = vsub.s32 0, %v61_v9  ;;  %v82_v19 = vsub.s32 1, %v61_v9  ;;  %p224_p2 = scmp.ne.s32.totalorder %s153_s7, %s223_s8  ;;  %p229_p4 = scmp.lt.s32.totalorder %s223_s8, %s223_s8 }
  0x2d   :  { %p230_p5 = por %p229_p4, %p228_p3 }
  0x2f   :  { %54 = vadd.xlane.f32.xlu0 %v53_v6  ;;  %p231_p6 = pnand %p230_p5, %p224_p2 }
  0xb8   :  { %v52_v10 = vpop.xlane.xlu0 %51 }
  0xb9   :  { %v63_v13 = vrot.slane %v52_v10, %v62_v11 }
  0xbc   :  { %v55_v12 = vpop.xlane.xlu0 %54 }
  0xbd   :  { %v67_v14 = vrot.slane %v55_v12, %v62_v11 }
  0xbf   :  { %v69_v15 = vsel %vm68_vm1, %v67_v14, %v63_v13 }
  0xc0   :  { %v72_v16 = vsel %vm71_vm2, %v69_v15, -inf }
  0xc1   :  { %73 = vmax.xlane.f32.xlu1 %v72_v16 }
 0x14e   :  { %v74_v20 = vpop.xlane.xlu1 %73 }
 0x14f   :  { %v79_v21 = vrot.slane %v74_v20, %v78_v18  ;;  %v83_v22 = vrot.slane %v74_v20, %v82_v19 }
 0x151   :  { %v86_v23 = vsub.f32 %v52_v10, %v79_v21  ;;  %v87_v24 = vsub.f32 %v55_v12, %v83_v22 }
 0x153   :  { %v88_v25 = vmul.f32 1.442695, %v86_v23  ;;  %v90_v26 = vmul.f32 1.442695, %v87_v24 }
 0x155   :  { %171 = vpow2.f32 %v88_v25 }
 0x156   :  { %173 = vpow2.f32 %v90_v26 }
 0x15f   :  { %v172_v27 = vpop.eup %171 }
 0x160   :  { %v174_v28 = vpop.eup %173  ;;  %95 = vperm.xlu1 %169, %v172_v27  }
 0x161   :  { %98 = vperm.xlu0 %170, %v174_v28  }
 0x1df   :  { %v96_v29 = vpop.permute.xlu1 %95 }
 0x1e0   :  { %v99_v30 = vpop.permute.xlu0 %98  ;;  %v103_v31 = vrot.slane %v96_v29, %v62_v11  ;;  %v115_v36 = vmul.f32 %v96_v29, %v38_v0 }
 0x1e1   :  { %v107_v32 = vrot.slane %v99_v30, %v62_v11  ;;  %v116_v35 = vmul.f32 %v99_v30, %v39_v2 }
 0x1e2   :  { %v117_v38 = vsel %vm49_vm0, %v115_v36, 0.0 }
 0x1e3   :  { %v108_v33 = vsel %vm68_vm1, %v107_v32, %v103_v31  ;;  %v124_v37 = vsel %vm49_vm0, %v116_v35, 0.0  ;;  %v118_v40 = vrot.slane %v117_v38, 4 }
 0x1e4   :  { %v110_v34 = vsel %vm71_vm2, %v108_v33, 0.0  ;;  %v125_v39 = vrot.slane %v124_v37, 4 }
 0x1e5   :  { %111 = vadd.xlane.f32.xlu1 %v110_v34  ;;  %v119_v42 = vadd.f32 %v118_v40, %v117_v38 }
 0x1e6   :  { %v126_v41 = vadd.f32 %v125_v39, %v124_v37 }
 0x1e7   :  { %v120_v46 = vrot.slane %v119_v42, 2 }
 0x1e8   :  { %v127_v43 = vrot.slane %v126_v41, 2 }
 0x1e9   :  { %v121_v48 = vadd.f32 %v120_v46, %v119_v42 }
 0x1ea   :  { %v128_v47 = vadd.f32 %v127_v43, %v126_v41 }
 0x1eb   :  { %v122_v50 = vrot.slane %v121_v48, 1 }
 0x1ec   :  { %v129_v49 = vrot.slane %v128_v47, 1 }
 0x1ed   :  { %v123_v54 = vadd.f32 %v122_v50, %v121_v48 }
 0x1ee   :  { %v130_v52 = vadd.f32 %v129_v49, %v128_v47 }
 0x272   :  { %v112_v44 = vpop.xlane.xlu1 %111 }
 0x273   :  { %v132_v45 = vrot.slane %v112_v44, 1  ;;  %175 = vrcp.f32 %v112_v44 }
 0x275   :  { %177 = vrcp.f32 %v132_v45 }
 0x27d   :  { %v176_v51 = vpop.eup %175 }
 0x27e   :  { %v136_v56 = vmul.f32 %v176_v51, %v123_v54 }
 0x27f   :  { %v178_v53 = vpop.eup %177 }
 0x280   :  { %v138_v55 = vmul.f32 %v178_v53, %v130_v52 }
 0x282   :  { %v141_v57 = vrot.slane %v138_v55, 7 }
 0x284   :  { %v142_v58 = vsel %vm68_vm1, %v141_v57, %v136_v56 }
 0x285   :  { %145 = vst.msk [vmem:[#allocation7] sm:$0x3] %vm144_vm3, %v142_v58 }
 0x286   :  { %234 = shalt.err (!%p231_p6)
}
 0x287   :  { %s235_s11 = scalar_lea.hbm %s326_s2, 32 }
 0x288   :  { %p236_p7 = scmp.ne.s32.totalorder %s326_s2, %s235_s11  ;;  %p239_p8 = scmp.lt.u32.totalorder %s235_s11, %s326_s2 }
 0x28a   :  { %p241_p9 = pnand %p239_p8, %p236_p7 }
 0x28c   :  { %244 = shalt.err (!%p241_p9)
}
 0x28d   :  { %155 = dma.vmem_to_hbm [thread:$0]  %s153_s7, 32, %s326_s2, [#allocation4]  }
 0x28e   :  { %249 = dma.done.wait [#allocation4], 32  }
 0x28f   :  { %250 = vsyncadd [#allocation4], 4294967264 }
 0x290   :  { %159 = vsyncpa [#allocation3], 1 }
 0x291   :  { %160 = vsyncpa [#allocation6], 1 }
 0x292   :  { %161 = vsyncpa [#allocation4], 1 }

</bundles_post_ra>
